<compile_context>
chip_gen: v6e
topology: v6e:2x2x1
jax: 0.10.0
libtpu: 0.0.40
codegen_flags: <defaults>
</compile_context>

<pallas_src>
import jax
import jax.numpy as jnp
from jax import lax
from jax.experimental import pallas as pl
from jax.experimental.pallas import tpu as pltpu


def _round_up(x, m):
    return (x + m - 1) // m * m


def _mlp_kernel(x_ref, w1_ref, b1_ref, w2_ref, b2_ref, w3_ref, b3_ref,
                w4_ref, b4_ref, o_ref):
    # x tile: (TB, N_feat) f32 straight from HBM; cast to bf16 on the VPU
    # (overlapped with the next tile's DMA) so the MXU sees bf16 operands.
    x = x_ref[...].astype(jnp.bfloat16)

    h = jnp.dot(x, w1_ref[...], preferred_element_type=jnp.float32) + b1_ref[...]
    h = jnp.maximum(h, 0.0)                                      # f32 elementwise (v5e-safe)

    h = jnp.dot(h.astype(jnp.bfloat16), w2_ref[...],
                preferred_element_type=jnp.float32) + b2_ref[...]
    h = jnp.maximum(h, 0.0)

    h = jnp.dot(h.astype(jnp.bfloat16), w3_ref[...],
                preferred_element_type=jnp.float32) + b3_ref[...]
    h = jnp.maximum(h, 0.0)

    # Final Linear(8, 1): contract the 8-wide hidden dim of (1,8) against the
    # last dim of (TB,8) so the result is produced lane-dense as (1, TB).
    logits = lax.dot_general(
        w4_ref[...], h.astype(jnp.bfloat16),
        dimension_numbers=(((1,), (1,)), ((), ())),
        preferred_element_type=jnp.float32) + b4_ref[...]
    o_ref[...] = logits.astype(o_ref.dtype)


def _vmem_limit_bytes():
    """Per-generation scoped-VMEM request with ~16 MiB headroom for compiler scratch."""
    cap = 64 << 20  # conservative fallback (v7x per-TC capacity)
    try:
        cap = int(pltpu.get_tpu_info().vmem_capacity_bytes)
    except Exception:
        pass
    return int(min(max(cap - (16 << 20), 32 << 20), 100 << 20))


def _choose_tb(batch, n_feat, vmem_limit, weight_bytes):
    """Rows of x per grid step: size the double-buffered f32 x tile to the VMEM
    budget, keep >=2 grid steps for megacore when the batch allows, and round to
    a lane-friendly multiple (128) so the (1, tb) output row is lane-dense."""
    budget = max(vmem_limit - weight_bytes - (4 << 20), 2 << 20)
    tb = budget // (2 * 4 * n_feat)          # 2 buffers x 4 B/elem x n_feat per row
    tb = max(8, min(tb, 2048))               # >2048 rows is past the DMA-efficiency knee
    if batch >= 256:
        tb = min(tb, -(-batch // 2))         # >=2 tiles -> both v7x TensorCores busy
    tb = min(tb, batch)
    g = 128 if tb >= 128 else 8
    return int(_round_up(tb, g))


def neural_network3_forward(x, params, *, tb=None):
    """x: (B, ...) -> flattened to (B, N_features). Returns (B, 1) f32 logits."""
    B = x.shape[0]
    x2d = x.reshape(B, -1).astype(jnp.float32)   # metadata-only for contiguous f32 input
    n_feat = x2d.shape[1]
    (w1, b1), (w2, b2), (w3, b3), (w4, b4) = params

    # Weights -> bf16 rows/cols for the MXU; biases stay f32. One-time tiny casts.
    w1b, w2b, w3b = (w.astype(jnp.bfloat16) for w in (w1, w2, w3))
    b1f, b2f, b3f = (b.reshape(1, -1).astype(jnp.float32) for b in (b1, b2, b3))
    w4r = w4.reshape(1, -1).astype(jnp.bfloat16)     # (1, 8)
    b4f = b4.reshape(1, 1).astype(jnp.float32)

    weight_bytes = sum(int(a.size) * a.dtype.itemsize
                       for a in (w1b, b1f, w2b, b2f, w3b, b3f, w4r, b4f))
    vmem_limit = _vmem_limit_bytes()
    if tb is None:
        tb = _choose_tb(B, n_feat, vmem_limit, weight_bytes)
    else:
        tb = int(_round_up(max(8, int(tb)), 128 if tb >= 128 else 8))

    num_tiles = pl.cdiv(B, tb)      # ragged last x block handled by Pallas; no jnp.pad
    resident = lambda i: (0, 0)     # weights/biases: same block every step -> stay in VMEM

    flops = 2 * B * (n_feat * 32 + 32 * 16 + 16 * 8 + 8 * 1)
    bytes_accessed = int(x2d.size) * 4 + weight_bytes + B * 4

    out = pl.pallas_call(
        _mlp_kernel,
        out_shape=jax.ShapeDtypeStruct((num_tiles, tb), jnp.float32),
        grid=(num_tiles,),
        in_specs=[
            pl.BlockSpec((tb, n_feat), lambda i: (i, 0)),
            pl.BlockSpec(w1b.shape, resident),
            pl.BlockSpec(b1f.shape, resident),
            pl.BlockSpec(w2b.shape, resident),
            pl.BlockSpec(b2f.shape, resident),
            pl.BlockSpec(w3b.shape, resident),
            pl.BlockSpec(b3f.shape, resident),
            pl.BlockSpec(w4r.shape, resident),
            pl.BlockSpec(b4f.shape, resident),
        ],
        out_specs=pl.BlockSpec((1, tb), lambda i: (i, 0)),   # lane-dense output row
        compiler_params=pltpu.CompilerParams(
            dimension_semantics=("parallel",),
            vmem_limit_bytes=vmem_limit,
        ),
        cost_estimate=pl.CostEstimate(
            flops=flops, transcendentals=0, bytes_accessed=bytes_accessed),
    )(x2d, w1b, b1f, w2b, b2f, w3b, b3f, w4r, b4f)

    # (num_tiles, tb) -> (B, 1); garbage rows from the ragged last tile are dropped.
    return out.reshape(-1)[:B].reshape(B, 1)


def init_params(key, n_features):
    """Deterministic init mimicking PyTorch Linear: U(-1/sqrt(fan_in), 1/sqrt(fan_in)).
    Weights stored transposed vs. PyTorch as (in, out) so the kernel computes x @ W + b."""
    dims = [n_features, 32, 16, 8, 1]
    params = []
    for i in range(4):
        fan_in, fan_out = dims[i], dims[i + 1]
        key, kw, kb = jax.random.split(key, 3)
        bound = 1.0 / (fan_in ** 0.5)
        w = jax.random.uniform(kw, (fan_in, fan_out), jnp.float32, -bound, bound)
        b = jax.random.uniform(kb, (1, fan_out), jnp.float32, -bound, bound)
        params.append((w, b))
    return params


if __name__ == "__main__":
    key = jax.random.PRNGKey(0)
    k_x, k_p = jax.random.split(key)

    B, C, H, W = 2, 4, 16, 16
    N_FEATURES = C * H * W
    x = jax.random.normal(k_x, (B, C, H, W), jnp.float32)
    params = init_params(k_p, N_FEATURES)

    out = neural_network3_forward(x, params)
    jax.block_until_ready(out)
    assert out.shape == (B, 1)

    # Reference 1: emulate the kernel's bf16 matmul arithmetic (tight tolerance).
    act = x.reshape(B, -1).astype(jnp.float32)
    for (w, b) in params[:3]:
        act = jnp.dot(act.astype(jnp.bfloat16), w.astype(jnp.bfloat16),
                      preferred_element_type=jnp.float32) + b.reshape(1, -1)
        act = jnp.maximum(act, 0.0)
    w4, b4 = params[3]
    ref_bf16 = jnp.dot(act.astype(jnp.bfloat16), w4.astype(jnp.bfloat16),
                       preferred_element_type=jnp.float32) + b4.reshape(1, 1)
    assert jnp.allclose(out, ref_bf16, atol=1e-4, rtol=1e-4)

    # Reference 2: full f32 module semantics (loose tolerance for bf16 matmuls).
    ref = x.reshape(B, -1)
    for i, (w, b) in enumerate(params):
        ref = ref @ w + b.reshape(1, -1)
        if i < 3:
            ref = jnp.maximum(ref, 0.0)
    assert jnp.allclose(out, ref, atol=5e-2, rtol=5e-2)

    print("KERNEL_OK")
</pallas_src>

<mosaic_0001>
module attributes {stable_mosaic.version = 11 : i64} {
  func.func @_mlp_kernel(%arg0: i32, %arg1: memref<8x1024xf32, #tpu.memory_space<vmem>>, %arg2: memref<1024x32xbf16, #tpu.memory_space<vmem>>, %arg3: memref<1x32xf32, #tpu.memory_space<vmem>>, %arg4: memref<32x16xbf16, #tpu.memory_space<vmem>>, %arg5: memref<1x16xf32, #tpu.memory_space<vmem>>, %arg6: memref<16x8xbf16, #tpu.memory_space<vmem>>, %arg7: memref<1x8xf32, #tpu.memory_space<vmem>>, %arg8: memref<1x8xbf16, #tpu.memory_space<vmem>>, %arg9: memref<1x1xf32, #tpu.memory_space<vmem>>, %arg10: memref<1x8xf32, #tpu.memory_space<vmem>>) attributes {dimension_semantics = [#tpu.dimension_semantics<parallel>], iteration_bounds = array<i64: 1>, scalar_prefetch = 0 : i64, scratch_operands = 0 : i64, tpu.core_type = #tpu.core_type<tc>, window_params = [{transform_indices = @transform_0, window_bounds = array<i64: 8, 1024>}, {pipeline_mode = #tpu.pipeline_mode<synchronous>, transform_indices = @transform_1, window_bounds = array<i64: 1024, 32>}, {pipeline_mode = #tpu.pipeline_mode<synchronous>, transform_indices = @transform_2, window_bounds = array<i64: 1, 32>}, {pipeline_mode = #tpu.pipeline_mode<synchronous>, transform_indices = @transform_3, window_bounds = array<i64: 32, 16>}, {pipeline_mode = #tpu.pipeline_mode<synchronous>, transform_indices = @transform_4, window_bounds = array<i64: 1, 16>}, {pipeline_mode = #tpu.pipeline_mode<synchronous>, transform_indices = @transform_5, window_bounds = array<i64: 16, 8>}, {pipeline_mode = #tpu.pipeline_mode<synchronous>, transform_indices = @transform_6, window_bounds = array<i64: 1, 8>}, {pipeline_mode = #tpu.pipeline_mode<synchronous>, transform_indices = @transform_7, window_bounds = array<i64: 1, 8>}, {pipeline_mode = #tpu.pipeline_mode<synchronous>, transform_indices = @transform_8, window_bounds = array<i64: 1, 1>}, {transform_indices = @transform_9, window_bounds = array<i64: 1, 8>}]} {
    %c0 = arith.constant 0 : index
    %c0_0 = arith.constant 0 : index
    %0 = vector.load %arg1[%c0, %c0_0] : memref<8x1024xf32, #tpu.memory_space<vmem>>, vector<8x1024xf32>
    %1 = arith.truncf %0 : vector<8x1024xf32> to vector<8x1024xbf16>
    %c0_1 = arith.constant 0 : index
    %c0_2 = arith.constant 0 : index
    %2 = vector.load %arg2[%c0_1, %c0_2] : memref<1024x32xbf16, #tpu.memory_space<vmem>>, vector<1024x32xbf16>
    %cst = arith.constant dense<0.000000e+00> : vector<8x32xf32>
    %3 = tpu.matmul %1, %2, %cst {dimension_numbers = #tpu.dot_dimension_numbers<[1], [0], [0], [1], [0, 0, 1, 1], [], []>} : vector<8x1024xbf16>, vector<1024x32xbf16>, vector<8x32xf32> -> vector<8x32xf32>
    %c0_3 = arith.constant 0 : index
    %c0_4 = arith.constant 0 : index
    %4 = vector.load %arg3[%c0_3, %c0_4] : memref<1x32xf32, #tpu.memory_space<vmem>>, vector<1x32xf32>
    %5 = vector.broadcast %4 : vector<1x32xf32> to vector<8x32xf32>
    %6 = arith.addf %3, %5 : vector<8x32xf32>
    %cst_5 = arith.constant 0.000000e+00 : f32
    %7 = vector.broadcast %cst_5 : f32 to vector<8x32xf32>
    %8 = arith.maximumf %6, %7 : vector<8x32xf32>
    %9 = arith.truncf %8 : vector<8x32xf32> to vector<8x32xbf16>
    %c0_6 = arith.constant 0 : index
    %c0_7 = arith.constant 0 : index
    %10 = vector.load %arg4[%c0_6, %c0_7] : memref<32x16xbf16, #tpu.memory_space<vmem>>, vector<32x16xbf16>
    %cst_8 = arith.constant dense<0.000000e+00> : vector<8x16xf32>
    %11 = tpu.matmul %9, %10, %cst_8 {dimension_numbers = #tpu.dot_dimension_numbers<[1], [0], [0], [1], [0, 0, 1, 1], [], []>} : vector<8x32xbf16>, vector<32x16xbf16>, vector<8x16xf32> -> vector<8x16xf32>
    %c0_9 = arith.constant 0 : index
    %c0_10 = arith.constant 0 : index
    %12 = vector.load %arg5[%c0_9, %c0_10] : memref<1x16xf32, #tpu.memory_space<vmem>>, vector<1x16xf32>
    %13 = vector.broadcast %12 : vector<1x16xf32> to vector<8x16xf32>
    %14 = arith.addf %11, %13 : vector<8x16xf32>
    %cst_11 = arith.constant 0.000000e+00 : f32
    %15 = vector.broadcast %cst_11 : f32 to vector<8x16xf32>
    %16 = arith.maximumf %14, %15 : vector<8x16xf32>
    %17 = arith.truncf %16 : vector<8x16xf32> to vector<8x16xbf16>
    %c0_12 = arith.constant 0 : index
    %c0_13 = arith.constant 0 : index
    %18 = vector.load %arg6[%c0_12, %c0_13] : memref<16x8xbf16, #tpu.memory_space<vmem>>, vector<16x8xbf16>
    %cst_14 = arith.constant dense<0.000000e+00> : vector<8x8xf32>
    %19 = tpu.matmul %17, %18, %cst_14 {dimension_numbers = #tpu.dot_dimension_numbers<[1], [0], [0], [1], [0, 0, 1, 1], [], []>} : vector<8x16xbf16>, vector<16x8xbf16>, vector<8x8xf32> -> vector<8x8xf32>
    %c0_15 = arith.constant 0 : index
    %c0_16 = arith.constant 0 : index
    %20 = vector.load %arg7[%c0_15, %c0_16] : memref<1x8xf32, #tpu.memory_space<vmem>>, vector<1x8xf32>
    %21 = vector.broadcast %20 : vector<1x8xf32> to vector<8x8xf32>
    %22 = arith.addf %19, %21 : vector<8x8xf32>
    %cst_17 = arith.constant 0.000000e+00 : f32
    %23 = vector.broadcast %cst_17 : f32 to vector<8x8xf32>
    %24 = arith.maximumf %22, %23 : vector<8x8xf32>
    %c0_18 = arith.constant 0 : index
    %c0_19 = arith.constant 0 : index
    %25 = vector.load %arg8[%c0_18, %c0_19] : memref<1x8xbf16, #tpu.memory_space<vmem>>, vector<1x8xbf16>
    %26 = arith.truncf %24 : vector<8x8xf32> to vector<8x8xbf16>
    %cst_20 = arith.constant dense<0.000000e+00> : vector<1x8xf32>
    %27 = tpu.matmul %25, %26, %cst_20 {dimension_numbers = #tpu.dot_dimension_numbers<[1], [1], [0], [0], [0, 0, 1, 0], [], []>} : vector<1x8xbf16>, vector<8x8xbf16>, vector<1x8xf32> -> vector<1x8xf32>
    %c0_21 = arith.constant 0 : index
    %c0_22 = arith.constant 0 : index
    %28 = vector.load %arg9[%c0_21, %c0_22] : memref<1x1xf32, #tpu.memory_space<vmem>>, vector<1x1xf32>
    %29 = vector.broadcast %28 : vector<1x1xf32> to vector<1x8xf32>
    %30 = arith.addf %27, %29 : vector<1x8xf32>
    %c0_23 = arith.constant 0 : index
    %c0_24 = arith.constant 0 : index
    %31 = vector.load %arg10[%c0_23, %c0_24] : memref<1x8xf32, #tpu.memory_space<vmem>>, vector<1x8xf32>
    tpu.vector_store %arg10[%c0_23, %c0_24], %30 {strides = array<i32>} : memref<1x8xf32, #tpu.memory_space<vmem>>, vector<1x8xf32>,
    return
  }
  func.func @transform_0(%arg0: i32) -> (i32, i32) {
    %c0_i32 = arith.constant 0 : i32
    %c0_i32_0 = arith.constant 0 : i32
    return %arg0, %c0_i32 : i32, i32
  }
  func.func @transform_1(%arg0: i32) -> (i32, i32) {
    %c0_i32 = arith.constant 0 : i32
    %c0_i32_0 = arith.constant 0 : i32
    %c0_i32_1 = arith.constant 0 : i32
    return %c0_i32, %c0_i32_0 : i32, i32
  }
  func.func @transform_2(%arg0: i32) -> (i32, i32) {
    %c0_i32 = arith.constant 0 : i32
    %c0_i32_0 = arith.constant 0 : i32
    %c0_i32_1 = arith.constant 0 : i32
    return %c0_i32, %c0_i32_0 : i32, i32
  }
  func.func @transform_3(%arg0: i32) -> (i32, i32) {
    %c0_i32 = arith.constant 0 : i32
    %c0_i32_0 = arith.constant 0 : i32
    %c0_i32_1 = arith.constant 0 : i32
    return %c0_i32, %c0_i32_0 : i32, i32
  }
  func.func @transform_4(%arg0: i32) -> (i32, i32) {
    %c0_i32 = arith.constant 0 : i32
    %c0_i32_0 = arith.constant 0 : i32
    %c0_i32_1 = arith.constant 0 : i32
    return %c0_i32, %c0_i32_0 : i32, i32
  }
  func.func @transform_5(%arg0: i32) -> (i32, i32) {
    %c0_i32 = arith.constant 0 : i32
    %c0_i32_0 = arith.constant 0 : i32
    %c0_i32_1 = arith.constant 0 : i32
    return %c0_i32, %c0_i32_0 : i32, i32
  }
  func.func @transform_6(%arg0: i32) -> (i32, i32) {
    %c0_i32 = arith.constant 0 : i32
    %c0_i32_0 = arith.constant 0 : i32
    %c0_i32_1 = arith.constant 0 : i32
    return %c0_i32, %c0_i32_0 : i32, i32
  }
  func.func @transform_7(%arg0: i32) -> (i32, i32) {
    %c0_i32 = arith.constant 0 : i32
    %c0_i32_0 = arith.constant 0 : i32
    %c0_i32_1 = arith.constant 0 : i32
    return %c0_i32, %c0_i32_0 : i32, i32
  }
  func.func @transform_8(%arg0: i32) -> (i32, i32) {
    %c0_i32 = arith.constant 0 : i32
    %c0_i32_0 = arith.constant 0 : i32
    %c0_i32_1 = arith.constant 0 : i32
    return %c0_i32, %c0_i32_0 : i32, i32
  }
  func.func @transform_9(%arg0: i32) -> (i32, i32) {
    %c0_i32 = arith.constant 0 : i32
    %c0_i32_0 = arith.constant 0 : i32
    return %arg0, %c0_i32 : i32, i32
  }
}

</mosaic_0001>

<bundles_post_ra>
// kernel: tpu_custom_call.1
= control target key start
LH: loop header
LB: loop body
LE: loop exit
PB: predicated region body
PF: predicated region fallthrough
CT: control target
= control target key end

     0   :  { %s1635_s0 = inlined_call_operand.vmem [shape: f32[2,1024], index: 0, kind: input, shape index: {}]   ;;  %s1636_s1 = inlined_call_operand.vmem [shape: bf16[1024,32], index: 1, kind: input, shape index: {}]   ;;  %s1637_s2 = inlined_call_operand.vmem [shape: f32[1,32], index: 2, kind: input, shape index: {}]   ;;  %s1638_s3 = inlined_call_operand.vmem [shape: bf16[32,16], index: 3, kind: input, shape index: {}]   ;;  %s1639_s4 = inlined_call_operand.vmem [shape: f32[1,16], index: 4, kind: input, shape index: {}]   ;;  %s1640_s5 = inlined_call_operand.vmem [shape: bf16[16,8], index: 5, kind: input, shape index: {}]   ;;  %s1641_s6 = inlined_call_operand.vmem [shape: f32[1,8], index: 6, kind: input, shape index: {}]   ;;  %s1642_s7 = inlined_call_operand.vmem [shape: bf16[1,8], index: 7, kind: input, shape index: {}]   ;;  %s1643_s8 = inlined_call_operand.<no memory space> [shape: f32[1,1], index: 8, kind: input, shape index: {}]   ;;  %s1644_s9 = inlined_call_operand.hbm [shape: f32[1,8], index: 9, kind: output, shape index: {}]  }
   0x1   :  { %v14_v0 = vstv %s1643_s8 }
   0x2   :  { %15 = vst [vmem:[#allocation2] sm:$0x1] %v14_v0 }
   0x3   :  { %v1219_v1 = vld [vmem:[%s1636_s1 + $0x78] sm:$0xff]   ;;  %v1223_v5 = vld [vmem:[%s1636_s1 + $0x70] sm:$0xff]   ;;  %v1227_v9 = vld [vmem:[%s1636_s1 + $0x68] sm:$0xff]   ;;  %v59_v31 = vlaneseq  ;;  %v1320_v36 = vmov 1983009808  }
   0x4   :  { %v1220_v2 = vld [vmem:[%s1636_s1 + $0xf8] sm:$0xff]   ;;  %1098 = vmatprep.subr.bf16.mxu0 %v1219_v1  ;;  %v1224_v6 = vld [vmem:[%s1636_s1 + $0xf0] sm:$0xff]   ;;  %v1228_v10 = vld [vmem:[%s1636_s1 + $0xe8] sm:$0xff]   ;;  %v57_v37 = vunpack.c.l.s4 %v1320_v36 }
   0x5   :  { %v1221_v3 = vld [vmem:[%s1636_s1 + $0x38] sm:$0xff]   ;;  %1120 = vmatprep.subr.bf16.mxu1 %v1220_v2  ;;  %v1225_v7 = vld [vmem:[%s1636_s1 + $0x30] sm:$0xff]   ;;  %v1229_v11 = vld [vmem:[%s1636_s1 + $0x28] sm:$0xff]   ;;  %v1480_v38 = vshrl.u32 %v59_v31, 7 }
   0x6   :  { %v1222_v4 = vld [vmem:[%s1636_s1 + $0xb8] sm:$0xff]   ;;  %1099 = vmatpush3.bf16.msra.mxu0 %v1221_v3  ;;  %v1226_v8 = vld [vmem:[%s1636_s1 + $0xb0] sm:$0xff]   ;;  %v1230_v12 = vld [vmem:[%s1636_s1 + $0xa8] sm:$0xff]   ;;  %v58_v41 = vunpack.c.0.s8 %v57_v37 }
   0x7   :  { %1121 = vmatpush3.bf16.msra.mxu1 %v1222_v4  ;;  %1100 = vmatprep.subr.bf16.mxu0 %v1223_v5  ;;  %v1231_v13 = vld [vmem:[%s1636_s1 + $0x60] sm:$0xff]   ;;  %v1235_v17 = vld [vmem:[%s1636_s1 + $0x58] sm:$0xff]   ;;  %v1239_v21 = vld [vmem:[%s1636_s1 + $0x50] sm:$0xff]  }
   0x8   :  { %1122 = vmatprep.subr.bf16.mxu1 %v1224_v6  ;;  %v1232_v14 = vld [vmem:[%s1636_s1 + $0xe0] sm:$0xff]   ;;  %v1236_v18 = vld [vmem:[%s1636_s1 + $0xd8] sm:$0xff]   ;;  %v1240_v22 = vld [vmem:[%s1636_s1 + $0xd0] sm:$0xff]   ;;  %v1495_v44 = vsub.s32 %v58_v41, %v1480_v38 }
   0x9   :  { %v1233_v15 = vld [vmem:[%s1636_s1 + $0x20] sm:$0xff]   ;;  %v1237_v19 = vld [vmem:[%s1636_s1 + $0x18] sm:$0xff]   ;;  %v1241_v23 = vld [vmem:[%s1636_s1 + $0x10] sm:$0xff]  }
   0xa   :  { %1101 = vmatpush3.bf16.msra.mxu0 %v1225_v7  ;;  %v1234_v16 = vld [vmem:[%s1636_s1 + $0xa0] sm:$0xff]   ;;  %v1238_v20 = vld [vmem:[%s1636_s1 + $0x98] sm:$0xff]   ;;  %v1242_v24 = vld [vmem:[%s1636_s1 + $0x90] sm:$0xff]  }
   0xb   :  { %1123 = vmatpush3.bf16.msra.mxu1 %v1226_v8  ;;  %1102 = vmatprep.subr.bf16.mxu0 %v1227_v9  ;;  %v1243_v25 = vld [vmem:[%s1636_s1 + $0x48] sm:$0xff]   ;;  %v1247_v29 = vld [vmem:[%s1636_s1 + $0x40] sm:$0xff]   ;;  %v1257_v42 = vld [vmem:[%s1636_s1 + $0x178] sm:$0xff]  }
   0xc   :  { %1124 = vmatprep.subr.bf16.mxu1 %v1228_v10  ;;  %v1244_v26 = vld [vmem:[%s1636_s1 + $0xc8] sm:$0xff]   ;;  %v1248_v30 = vld [vmem:[%s1636_s1 + $0xc0] sm:$0xff]   ;;  %v1258_v43 = vld [vmem:[%s1636_s1 + $0x1f8] sm:$0xff]  }
   0xd   :  { %v1245_v27 = vld [vmem:[%s1636_s1 + $0x8] sm:$0xff]   ;;  %v1249_v32 = vld [vmem:[%s1636_s1] sm:$0xff]   ;;  %v1259_v53 = vld [vmem:[%s1636_s1 + $0x138] sm:$0xff]  }
   0xe   :  { %1103 = vmatpush3.bf16.msra.mxu0 %v1229_v11  ;;  %v1246_v28 = vld [vmem:[%s1636_s1 + $0x88] sm:$0xff]   ;;  %v1250_v33 = vld [vmem:[%s1636_s1 + $0x80] sm:$0xff]   ;;  %v1260_v54 = vld [vmem:[%s1636_s1 + $0x1b8] sm:$0xff]  }
   0xf   :  { %1125 = vmatpush3.bf16.msra.mxu1 %v1230_v12  ;;  %1104 = vmatprep.subr.bf16.mxu0 %v1231_v13  ;;  %v1251_v34 = vld [vmem:[%s1635_s0] ss:$16 sps:$4 sm:$0xff]   ;;  %v1255_v39 = vld [vmem:[%s1635_s0 + $0x4] ss:$16 sps:$4 sm:$0xff]   ;;  %v1265_v63 = vld [vmem:[%s1636_s1 + $0x168] sm:$0xff]  }
  0x10   :  { %1126 = vmatprep.subr.bf16.mxu1 %v1232_v14  ;;  %v1253_v35 = vld [vmem:[%s1635_s0 + $0x20] ss:$16 sps:$4 sm:$0xff]   ;;  %v1256_v40 = vld [vmem:[%s1635_s0 + $0x24] ss:$16 sps:$4 sm:$0xff]   ;;  %v62_v45 = vrot.slane %v1251_v34, %v1495_v44  ;;  %v69_v47 = vrot.slane %v1255_v39, %v1495_v44  ;;  %v1266_v0 = vld [vmem:[%s1636_s1 + $0x1e8] sm:$0xff]  }
  0x11   :  { %v76_v46 = vrot.slane %v1253_v35, %v1495_v44  ;;  %v83_v48 = vrot.slane %v1256_v40, %v1495_v44  ;;  %v1261_v59 = vld [vmem:[%s1636_s1 + $0x170] sm:$0xff]   ;;  %v1267_v1 = vld [vmem:[%s1636_s1 + $0x128] sm:$0xff]   ;;  %v1269_v3 = vld [vmem:[%s1636_s1 + $0x160] sm:$0xff]  }
  0x12   :  { %1105 = vmatpush3.bf16.msra.mxu0 %v1233_v15  ;;  %v1262_v60 = vld [vmem:[%s1636_s1 + $0x1f0] sm:$0xff]   ;;  %v1268_v2 = vld [vmem:[%s1636_s1 + $0x1a8] sm:$0xff]   ;;  %v1270_v4 = vld [vmem:[%s1636_s1 + $0x1e0] sm:$0xff]  }
  0x13   :  { %1127 = vmatpush3.bf16.msra.mxu1 %v1234_v16  ;;  %1106 = vmatprep.subr.bf16.mxu0 %v1235_v17  ;;  %v85_v49 = vcombine.high %v62_v45, %v76_v46  ;;  %v87_v50 = vcombine.high %v69_v47, %v83_v48  ;;  %v84_v51 = vcombine.low %v62_v45, %v76_v46  ;;  %v1263_v61 = vld [vmem:[%s1636_s1 + $0x130] sm:$0xff]   ;;  %v1271_v5 = vld [vmem:[%s1636_s1 + $0x120] sm:$0xff]   ;;  %v1273_v7 = vld [vmem:[%s1636_s1 + $0x158] sm:$0xff]  }
  0x14   :  { %1128 = vmatprep.subr.bf16.mxu1 %v1236_v18  ;;  %v86_v52 = vcombine.low %v69_v47, %v83_v48  ;;  %v1264_v62 = vld [vmem:[%s1636_s1 + $0x1b0] sm:$0xff]   ;;  %v1272_v6 = vld [vmem:[%s1636_s1 + $0x1a0] sm:$0xff]   ;;  %v1274_v8 = vld [vmem:[%s1636_s1 + $0x1d8] sm:$0xff]  }
  0x15   :  { %v133_v55 = vpack.c.bf16 %v85_v49, %v85_v49  ;;  %v135_v56 = vpack.c.bf16 %v87_v50, %v87_v50  ;;  %v132_v57 = vpack.c.bf16 %v84_v51, %v84_v51  ;;  %v1275_v9 = vld [vmem:[%s1636_s1 + $0x118] sm:$0xff]   ;;  %v1277_v11 = vld [vmem:[%s1636_s1 + $0x150] sm:$0xff]   ;;  %v1281_v15 = vld [vmem:[%s1636_s1 + $0x148] sm:$0xff]  }
  0x16   :  { %1107 = vmatpush3.bf16.msra.mxu0 %v1237_v19  ;;  %v134_v58 = vpack.c.bf16 %v86_v52, %v86_v52  ;;  %v1276_v10 = vld [vmem:[%s1636_s1 + $0x198] sm:$0xff]   ;;  %v1278_v12 = vld [vmem:[%s1636_s1 + $0x1d0] sm:$0xff]   ;;  %v1282_v16 = vld [vmem:[%s1636_s1 + $0x1c8] sm:$0xff]  }
  0x17   :  { %1129 = vmatpush3.bf16.msra.mxu1 %v1238_v20  ;;  %1108 = vmatprep.subr.bf16.mxu0 %v1239_v21  ;;  %v1279_v13 = vld [vmem:[%s1636_s1 + $0x110] sm:$0xff]   ;;  %v1283_v17 = vld [vmem:[%s1636_s1 + $0x108] sm:$0xff]   ;;  %v1285_v19 = vld [vmem:[%s1636_s1 + $0x140] sm:$0xff]  }
  0x18   :  { %1130 = vmatprep.subr.bf16.mxu1 %v1240_v22  ;;  %691 = vmatprep.mubr.bf16.mxu0 %v133_v55  ;;  %v1280_v14 = vld [vmem:[%s1636_s1 + $0x190] sm:$0xff]   ;;  %v1284_v18 = vld [vmem:[%s1636_s1 + $0x188] sm:$0xff]   ;;  %v1286_v20 = vld [vmem:[%s1636_s1 + $0x1c0] sm:$0xff]  }
  0x19   :  { %731 = vmatprep.mubr.bf16.mxu1 %v135_v56  ;;  %v1289_v21 = vld [vmem:[%s1635_s0 + $0x8] ss:$16 sps:$4 sm:$0xff]  }
  0x1a   :  { %1109 = vmatpush3.bf16.msra.mxu0 %v1241_v23  ;;  %v1291_v22 = vld [vmem:[%s1635_s0 + $0x28] ss:$16 sps:$4 sm:$0xff]   ;;  %v1293_v23 = vld [vmem:[%s1635_s0 + $0xc] ss:$16 sps:$4 sm:$0xff]  }
  0x1b   :  { %1131 = vmatpush3.bf16.msra.mxu1 %v1242_v24  ;;  %1110 = vmatprep.subr.bf16.mxu0 %v1243_v25  ;;  %v1287_v24 = vld [vmem:[%s1636_s1 + $0x100] sm:$0xff]   ;;  %v1294_v25 = vld [vmem:[%s1635_s0 + $0x2c] ss:$16 sps:$4 sm:$0xff]  }
  0x1c   :  { %1132 = vmatprep.subr.bf16.mxu1 %v1244_v26  ;;  %v98_v26 = vrot.slane %v1289_v21, %v1495_v44 }
  0x1e   :  { %1111 = vmatpush3.bf16.msra.mxu0 %v1245_v27  ;;  %v112_v27 = vrot.slane %v1291_v22, %v1495_v44 }
  0x1f   :  { %1133 = vmatpush3.bf16.msra.mxu1 %v1246_v28  ;;  %1112 = vmatprep.subr.bf16.mxu0 %v1247_v29  ;;  %v105_v28 = vrot.slane %v1293_v23, %v1495_v44  ;;  %v1288_v29 = vld [vmem:[%s1636_s1 + $0x180] sm:$0xff]  }
  0x20   :  { %1134 = vmatprep.subr.bf16.mxu1 %v1248_v30  ;;  %v119_v30 = vrot.slane %v1294_v25, %v1495_v44 }
  0x22   :  { %1113 = vmatpush3.bf16.msra.mxu0 %v1249_v32 }
  0x23   :  { %1135 = vmatpush3.bf16.msra.mxu1 %v1250_v33  ;;  %1142 = vmatprep.subr.bf16.mxu0 %v1257_v42 }
  0x24   :  { %1164 = vmatprep.subr.bf16.mxu1 %v1258_v43 }
  0x25   :  { %692 = vmatmul.mubr.bf16.vlgmr.msra.gmra.mxu0 %v132_v57 }
  0x26   :  { %732 = vmatmul.mubr.bf16.vlgmr.msra.gmra.mxu1 %v134_v58  ;;  %1143 = vmatpush3.bf16.msra.mxu0 %v1259_v53 }
  0x27   :  { %1165 = vmatpush3.bf16.msra.mxu1 %v1260_v54  ;;  %1144 = vmatprep.subr.bf16.mxu0 %v1261_v59 }
  0x28   :  { %1166 = vmatprep.subr.bf16.mxu1 %v1262_v60 }
  0x2a   :  { %1145 = vmatpush3.bf16.msra.mxu0 %v1263_v61 }
  0x2b   :  { %1167 = vmatpush3.bf16.msra.mxu1 %v1264_v62  ;;  %1146 = vmatprep.subr.bf16.mxu0 %v1265_v63 }
  0x2c   :  { %1168 = vmatprep.subr.bf16.mxu1 %v1266_v0 }
  0x2e   :  { %1147 = vmatpush3.bf16.msra.mxu0 %v1267_v1 }
  0x2f   :  { %1169 = vmatpush3.bf16.msra.mxu1 %v1268_v2  ;;  %1148 = vmatprep.subr.bf16.mxu0 %v1269_v3 }
  0x30   :  { %1170 = vmatprep.subr.bf16.mxu1 %v1270_v4 }
  0x32   :  { %1149 = vmatpush3.bf16.msra.mxu0 %v1271_v5 }
  0x33   :  { %1171 = vmatpush3.bf16.msra.mxu1 %v1272_v6  ;;  %1150 = vmatprep.subr.bf16.mxu0 %v1273_v7 }
  0x34   :  { %1172 = vmatprep.subr.bf16.mxu1 %v1274_v8 }
  0x36   :  { %1151 = vmatpush3.bf16.msra.mxu0 %v1275_v9 }
  0x37   :  { %1173 = vmatpush3.bf16.msra.mxu1 %v1276_v10  ;;  %1152 = vmatprep.subr.bf16.mxu0 %v1277_v11 }
  0x38   :  { %1174 = vmatprep.subr.bf16.mxu1 %v1278_v12 }
  0x3a   :  { %1153 = vmatpush3.bf16.msra.mxu0 %v1279_v13 }
  0x3b   :  { %1175 = vmatpush3.bf16.msra.mxu1 %v1280_v14  ;;  %1154 = vmatprep.subr.bf16.mxu0 %v1281_v15 }
  0x3c   :  { %1176 = vmatprep.subr.bf16.mxu1 %v1282_v16 }
  0x3e   :  { %1155 = vmatpush3.bf16.msra.mxu0 %v1283_v17 }
  0x3f   :  { %1177 = vmatpush3.bf16.msra.mxu1 %v1284_v18 }
  0x40   :  { %16 = vsyncpa [#allocation4], 0  ;;  %1156 = vmatprep.subr.bf16.mxu0 %v1285_v19  ;;  %1178 = vmatprep.subr.bf16.mxu1 %v1286_v20  ;;  %v121_v31 = vcombine.high %v98_v26, %v112_v27  ;;  %v120_v32 = vcombine.low %v98_v26, %v112_v27  ;;  %v123_v33 = vcombine.high %v105_v28, %v119_v30  ;;  %v1295_v40 = vld [vmem:[%s1638_s3 + $0x8] sm:$0xff]   ;;  %v1321_v41 = vmov 0.0   ;;  %v1296_v42 = vld [vmem:[%s1638_s3] sm:$0xff]  }
  0x41   :  { %v122_v34 = vcombine.low %v105_v28, %v119_v30  ;;  %vm1322_vm0 = vmmov 0   ;;  %v1025_v52 = vld [vmem:[%s1637_s2] ss:$0 sm:$0xff]  ;;  %vm844_vm1 = vcmask 261120   ;;  %vm905_vm2 = vcmask 130048  }
  0x42   :  { %v137_v35 = vpack.c.bf16 %v121_v31, %v121_v31  ;;  %v136_v36 = vpack.c.bf16 %v120_v32, %v120_v32  ;;  %1157 = vmatpush3.bf16.msra.mxu0 %v1287_v24  ;;  %v139_v37 = vpack.c.bf16 %v123_v33, %v123_v33  ;;  %v1297_v6 = vld [vmem:[%s1640_s5] sm:$0xff]   ;;  %v1323_v16 = vmov 0  }
  0x43   :  { %1179 = vmatpush3.bf16.msra.mxu1 %v1288_v29  ;;  %v138_v39 = vpack.c.bf16 %v122_v34, %v122_v34  ;;  %1193 = vmatprep.subr.bf16.mxu0 %v1321_v41  ;;  %v1090_v7 = vld [vmem:[%s1639_s4] ss:$0 sm:$0xff]  ;;  %vm962_vm3 = vcmask 64512   ;;  %v960_v27 = vsub.s32 0, %v1480_v38  ;;  %vm1009_vm4 = vcmask 57344  }
  0x44   :  { %771 = vmatprep.mubr.bf16.mxu0 %v137_v35  ;;  %811 = vmatprep.mubr.bf16.mxu1 %v139_v37  ;;  %v952_v15 = vld [vmem:[#allocation2] sm:$0x1] }
  0x45   :  { %772 = vmatmul.mubr.bf16.vlgmr.msra.gmra.mxu0 %v136_v36  ;;  %1201 = vmatprep.subr.bf16.mxu1 %v1321_v41  ;;  %v1094_v17 = vld [vmem:[%s1641_s6] ss:$0 sm:$0xff]  ;;  %s1324_s6 = smov [#allocation3]  }
  0x46   :  { %812 = vmatmul.mubr.bf16.vlgmr.msra.gmra.mxu1 %v138_v39  ;;  %1194 = vmatpush3.bf16.msra.mxu0 %v1295_v40  ;;  %v950_v26 = vld [vmem:[%s1642_s7] sm:$0x1]  ;;  %s1017_s30 = sshll.u32 %s1324_s6, 4  ;;  %s1018_s30 = int_to_ptr.vmem [resolvable:$true] %s1017_s30 }
  0x47   :  { %1195 = vmatprep.subr.bf16.mxu0 %v1321_v41  ;;  %1197 = vmatprep.mubr.msk.bf16.mxu0 %vm1322_vm0, %v1321_v41  ;;  %s1298_s10 = scalar_lea.vmem %s1018_s30, 16  ;;  %s1302_s11 = scalar_lea.vmem %s1018_s30, 32 }
  0x48   :  { %1203 = vmatprep.mubr.msk.bf16.mxu1 %vm1322_vm0, %v1321_v41  ;;  %1202 = vmatpush3.bf16.msra.mxu1 %v1297_v6  ;;  %p1299_p0 = scmp.ne.s32.totalorder %s1018_s30, %s1298_s10  ;;  %p1303_p1 = scmp.lt.s32.totalorder %s1018_s30, %s1018_s30 }
  0x49   :  { %1218 = vset.pattern.permute.xlu0 %v1323_v16  ;;  %p1304_p2 = scmp.lt.s32.totalorder %s1302_s11, %s1298_s10 }
  0x4a   :  { %1196 = vmatpush3.bf16.msra.mxu0 %v1296_v42  ;;  %955 = vperm.xlu0 %1218, %v952_v15  }
  0x4b   :  { %1207 = vmatprep.subr.bf16.mxu0 %v1321_v41  ;;  %p1305_p3 = por %p1304_p2, %p1303_p1 }
  0x4d   :  { %p1306_p4 = pnand %p1305_p3, %p1299_p0 }
  0xc5   :  { %v956_v28 = vpop.permute.xlu0 %955 }
  0xc6   :  { %v961_v29 = vrot.slane %v956_v28, %v960_v27 }
  0xe5   :  { %v1114_v43 = vpop.f32.mrf.mxu0 }
  0xe6   :  { %v1136_v44 = vpop.f32.mrf.mxu1 }
  0xe7   :  { %v1115_v45 = vpop.f32.mrf.mxu0 }
  0xe8   :  { %v1137_v46 = vpop.f32.mrf.mxu1  ;;  %v1116_v51 = vadd.f32 %v1115_v45, %v1114_v43 }
  0xe9   :  { %v1117_v47 = vpop.f32.mrf.mxu0  ;;  %v1138_v54 = vadd.f32 %v1137_v46, %v1136_v44 }
  0xea   :  { %v1139_v48 = vpop.f32.mrf.mxu1  ;;  %v694_v53 = vadd.f32 %v1116_v51, %v1025_v52 }
  0xeb   :  { %v1118_v49 = vpop.f32.mrf.mxu0 }
  0xec   :  { %v1140_v50 = vpop.f32.mrf.mxu1  ;;  %v734_v59 = vadd.f32 %v1138_v54, %v694_v53 }
 0x105   :  { %v1158_v55 = vpop.f32.mrf.mxu0 }
 0x106   :  { %v1180_v56 = vpop.f32.mrf.mxu1 }
 0x107   :  { %v1159_v57 = vpop.f32.mrf.mxu0 }
 0x108   :  { %v1181_v58 = vpop.f32.mrf.mxu1  ;;  %v1160_v60 = vadd.f32 %v1159_v57, %v1158_v55 }
 0x109   :  { %v1161_v61 = vpop.f32.mrf.mxu0  ;;  %v1182_v0 = vadd.f32 %v1181_v58, %v1180_v56 }
 0x10a   :  { %v1183_v62 = vpop.f32.mrf.mxu1  ;;  %v774_v63 = vadd.f32 %v1160_v60, %v734_v59 }
 0x10b   :  { %v1162_v1 = vpop.f32.mrf.mxu0 }
 0x10c   :  { %v1184_v2 = vpop.f32.mrf.mxu1  ;;  %v814_v3 = vadd.f32 %v1182_v0, %v774_v63 }
 0x10e   :  { %v819_v4 = vmax.f32 %v814_v3, 0.0 }
 0x110   :  { %v820_v5 = vpack.c.bf16 %v819_v4, %v819_v4 }
 0x112   :  { %1198 = vmatmul.mubr.msk.bf16.vlgmr.msra.gmra.mxu0 %vm844_vm1, %v820_v5 }
 0x113   :  { %1209 = vmatprep.mubr.msk.bf16.mxu0 %vm1322_vm0, %v1321_v41 }
 0x1d2   :  { %v882_v8 = vpop.f32.mrf.mxu0 }
 0x1d3   :  { %v883_v9 = vadd.f32 %v1090_v7, %v882_v8 }
 0x1d4   :  { %v1199_v10 = vpop.f32.mrf.mxu0 }
 0x1d5   :  { %v888_v11 = vmax.f32 %v883_v9, 0.0 }
 0x1d6   :  { %v885_v12 = vpop.f32.mrf.mxu0 }
 0x1d7   :  { %v889_v13 = vpack.c.bf16 %v888_v11, %v888_v11 }
 0x1d8   :  { %v1200_v14 = vpop.f32.mrf.mxu0 }
 0x1d9   :  { %1204 = vmatmul.mubr.msk.bf16.vlgmr.msra.gmra.mxu1 %vm905_vm2, %v889_v13 }
 0x299   :  { %v943_v18 = vpop.f32.mrf.mxu1 }
 0x29a   :  { %v944_v19 = vadd.f32 %v1094_v17, %v943_v18 }
 0x29b   :  { %v1205_v20 = vpop.f32.mrf.mxu1 }
 0x29c   :  { %v949_v21 = vmax.f32 %v944_v19, 0.0 }
 0x29d   :  { %v946_v22 = vpop.f32.mrf.mxu1 }
 0x29e   :  { %v951_v23 = vpack.c.bf16 %v949_v21, %v949_v21 }
 0x29f   :  { %v1206_v24 = vpop.f32.mrf.mxu1 }
 0x2a0   :  { %v967_v25 = vsel %vm962_vm3, %v951_v23, 0 }
 0x2a1   :  { %1208 = vmatpush3.bf16.xpose.msra.mxu0 %v967_v25 }
 0x2a8   :  { %1210 = vmatmul.mubr.msk.bf16.vlgmr.msra.gmra.mxu0 %vm962_vm3, %v950_v26 }
 0x368   :  { %v1003_v30 = vpop.f32.mrf.mxu0 }
 0x369   :  { %v1004_v31 = vadd.f32 %v1003_v30, %v961_v29 }
 0x36a   :  { %v1211_v32 = vpop.f32.mrf.mxu0 }
 0x36b   :  { %1010 = vst.msk [vmem:[#allocation3] sm:$0x1] %vm1009_vm4, %v1004_v31 }
 0x36c   :  { %v1006_v33 = vpop.f32.mrf.mxu0 }
 0x36d   :  { %1309 = shalt.err (!%p1306_p4)
}
 0x36e   :  { %1020 = dma.vmem_to_hbm [thread:$0]  %s1018_s30, 16, %s1644_s9, [#allocation4]   ;;  %v1212_v38 = vpop.f32.mrf.mxu0 }
 0x36f   :  { %1318 = dma.done.wait [#allocation4], 16  }
 0x370   :  { %1319 = vsyncadd [#allocation4], 4294967280 }
 0x371   :  { %1024 = vsyncpa [#allocation4], 1 }

</bundles_post_ra>
